<compile_context>
chip_gen: v7x
topology: tpu7x:2x2x1
jax: 0.10.0
libtpu: 0.0.40
codegen_flags: <defaults>
</compile_context>

<pallas_src>
from functools import partial

import jax
import jax.numpy as jnp
from jax.experimental import pallas as pl
from jax.experimental.pallas import tpu as pltpu

_LANE = 128
_SUBLANE = 8

# Trace-time tile-selection cost model (streaming f32, read + write per row).
_ROW_BYTES = _LANE * 4 * 2
_HBM_BYTES_PER_NS = 1000.0      # ~1 TB/s, conservative cross-generation value
_STEP_OVERHEAD_NS = 350.0       # measured per-grid-step overhead


def _round_up(a: int, m: int) -> int:
    return ((a + m - 1) // m) * m


def _pick_tile(rows_min: int, cap_rows: int) -> int:
    """Pick an 8-aligned row tile that minimizes (HBM bytes + grid overhead).

    Keeps the grid >= 2 steps whenever rows permit (v7x dual-TensorCore) and
    avoids the near-2x inter-tile padding blowup of blindly rounding rows up
    to a large fixed tile.
    """
    if rows_min <= _SUBLANE:
        return _SUBLANE
    cap = max(_SUBLANE, min(cap_rows, (rows_min // 2 // _SUBLANE) * _SUBLANE))
    best_t, best_cost = _SUBLANE, None
    for t in range(_SUBLANE, cap + 1, _SUBLANE):
        rows = _round_up(rows_min, t)
        cost = rows * _ROW_BYTES / _HBM_BYTES_PER_NS + (rows // t) * _STEP_OVERHEAD_NS
        if best_cost is None or cost < best_cost:
            best_t, best_cost = t, cost
    return best_t


def linear_kernel(w_ref, b_ref, x_ref, o_ref):
    # w_ref, b_ref: (1,) f32 scalars in SMEM. x_ref/o_ref: (tile_r, 128) VMEM.
    w = w_ref[0]
    b = b_ref[0]
    # Pure VPU fused multiply-add (scalar broadcast over the vreg lanes).
    o_ref[...] = (x_ref[...] * w + b).astype(o_ref.dtype)


@partial(jax.jit, static_argnames=("tile_rows",))
def linear_pallas(x, w, b, *, tile_rows: int = 2048):
    """x: (N, 1) f32, w: (1, 1) f32, b: (1,) f32 -> (N, 1) f32."""
    n, in_f = x.shape
    out_f = w.shape[0]
    assert in_f == 1 and out_f == 1 and w.shape == (1, 1) and b.shape == (1,)

    if n == 0:
        return jnp.zeros((0, out_f), x.dtype)

    # Lane-dense layout: view x as (rows, 128), padding only the tail.
    rows_needed = pl.cdiv(n, _LANE)
    rows_min = _round_up(max(rows_needed, 1), _SUBLANE)
    tile_r = _pick_tile(rows_min, tile_rows)
    rows = _round_up(rows_min, tile_r)
    total = rows * _LANE

    flat = x.reshape(-1)
    if total != n:
        # Tail-only pad; fuses into the pallas_call input via allow_input_fusion.
        flat = jnp.pad(flat, (0, total - n))
    x2d = flat.reshape(rows, _LANE)

    w_s = w.reshape(1)  # (1,) SMEM scalar
    b_s = b.reshape(1)  # (1,) SMEM scalar

    grid = (rows // tile_r,)

    y2d = pl.pallas_call(
        linear_kernel,
        out_shape=jax.ShapeDtypeStruct((rows, _LANE), x.dtype),
        grid=grid,
        in_specs=[
            pl.BlockSpec(memory_space=pltpu.MemorySpace.SMEM),   # w scalar
            pl.BlockSpec(memory_space=pltpu.MemorySpace.SMEM),   # b scalar
            pl.BlockSpec((tile_r, _LANE), lambda i: (i, 0)),     # x tile
        ],
        out_specs=pl.BlockSpec((tile_r, _LANE), lambda i: (i, 0)),
        compiler_params=pltpu.CompilerParams(
            dimension_semantics=("parallel",),
            allow_input_fusion=[False, False, True],
        ),
    )(w_s, b_s, x2d)

    # Undo the lane-dense layout plumbing (metadata-only when no pad was needed).
    y_flat = y2d.reshape(-1)
    if total != n:
        y_flat = y_flat[:n]
    return y_flat.reshape(n, out_f)


if __name__ == "__main__":
    key = jax.random.PRNGKey(0)
    k_x, k_w, k_b = jax.random.split(key, 3)

    # Small shapes consistent with Linear(1, 1): batch=8, in_features=1.
    N = 8
    x = jax.random.normal(k_x, (N, 1), dtype=jnp.float32)

    # Deterministic parameter init (mimics nn.Linear uniform(-1, 1) bound
    # since fan_in == 1); no checkpoint loading.
    w = jax.random.uniform(k_w, (1, 1), dtype=jnp.float32, minval=-1.0, maxval=1.0)
    b = jax.random.uniform(k_b, (1,), dtype=jnp.float32, minval=-1.0, maxval=1.0)

    y = linear_pallas(x, w, b)
    jax.block_until_ready(y)

    # Reference check against plain JAX.
    y_ref = x @ w.T + b[None, :]
    assert y.shape == (N, 1)
    assert jnp.allclose(y, y_ref, atol=1e-5, rtol=1e-5)

    print("KERNEL_OK")
</pallas_src>

<mosaic_0001>
module attributes {stable_mosaic.version = 11 : i64} {
  func.func @linear_kernel(%arg0: i32, %arg1: memref<1xf32, #tpu.memory_space<smem>>, %arg2: memref<1xf32, #tpu.memory_space<smem>>, %arg3: memref<8x128xf32, #tpu.memory_space<vmem>>, %arg4: memref<8x128xf32, #tpu.memory_space<vmem>>) attributes {dimension_semantics = [#tpu.dimension_semantics<parallel>], iteration_bounds = array<i64: 1>, scalar_prefetch = 0 : i64, scratch_operands = 0 : i64, tpu.core_type = #tpu.core_type<tc>, window_params = [{transform_indices = @transform_0, window_bounds = array<i64: 1>}, {transform_indices = @transform_1, window_bounds = array<i64: 1>}, {transform_indices = @transform_2, window_bounds = array<i64: 8, 128>}, {transform_indices = @transform_3, window_bounds = array<i64: 8, 128>}]} {
    %c0 = arith.constant 0 : index
    %0 = memref.load %arg1[%c0] : memref<1xf32, #tpu.memory_space<smem>>
    %c0_0 = arith.constant 0 : index
    %1 = memref.load %arg2[%c0_0] : memref<1xf32, #tpu.memory_space<smem>>
    %c0_1 = arith.constant 0 : index
    %c0_2 = arith.constant 0 : index
    %2 = vector.load %arg3[%c0_1, %c0_2] : memref<8x128xf32, #tpu.memory_space<vmem>>, vector<8x128xf32>
    %3 = vector.broadcast %0 : f32 to vector<8x128xf32>
    %4 = arith.mulf %2, %3 : vector<8x128xf32>
    %5 = vector.broadcast %1 : f32 to vector<8x128xf32>
    %6 = arith.addf %4, %5 : vector<8x128xf32>
    %c0_3 = arith.constant 0 : index
    %c0_4 = arith.constant 0 : index
    %7 = vector.load %arg4[%c0_3, %c0_4] : memref<8x128xf32, #tpu.memory_space<vmem>>, vector<8x128xf32>
    tpu.vector_store %arg4[%c0_3, %c0_4], %6 {strides = array<i32>} : memref<8x128xf32, #tpu.memory_space<vmem>>, vector<8x128xf32>,
    return
  }
  func.func @transform_0(%arg0: i32) -> i32 {
    %c0_i32 = arith.constant 0 : i32
    %c0_i32_0 = arith.constant 0 : i32
    return %c0_i32 : i32
  }
  func.func @transform_1(%arg0: i32) -> i32 {
    %c0_i32 = arith.constant 0 : i32
    %c0_i32_0 = arith.constant 0 : i32
    return %c0_i32 : i32
  }
  func.func @transform_2(%arg0: i32) -> (i32, i32) {
    %c0_i32 = arith.constant 0 : i32
    %c0_i32_0 = arith.constant 0 : i32
    return %arg0, %c0_i32 : i32, i32
  }
  func.func @transform_3(%arg0: i32) -> (i32, i32) {
    %c0_i32 = arith.constant 0 : i32
    %c0_i32_0 = arith.constant 0 : i32
    return %arg0, %c0_i32 : i32, i32
  }
}

</mosaic_0001>

<bundles_post_ra>
// kernel: linear_pallas.2
= control target key start
LH: loop header
LB: loop body
LE: loop exit
PB: predicated region body
PF: predicated region fallthrough
CT: control target
= control target key end

     0   :  { %v19_v2 = vlaneseq  ;;  %s77_s0 = inlined_call_operand.<no memory space> [shape: f32[1], index: 0, kind: input, shape index: {}]   ;;  %s78_s1 = inlined_call_operand.<no memory space> [shape: f32[1], index: 1, kind: input, shape index: {}]   ;;  %s79_s2 = inlined_call_operand.vmem [shape: f32[8], index: 2, kind: input, shape index: {}]   ;;  %s80_s3 = inlined_call_operand.<no memory space> [shape: f32[], index: 3, kind: input, shape index: {}]   ;;  %s81_s4 = inlined_call_operand.vmem [shape: f32[8,128], index: 4, kind: output, shape index: {}]  }
   0x1   :  { %v11_v0 = vstv %s80_s3  ;;  %v18_v1 = vld [vmem:[%s79_s2] sm:$0x1]  ;;  %v28_v3 = vstv %s77_s0  ;;  %v30_v5 = vstv %s78_s1 }
   0x2   :  { %vm21_vm0 = vcmp.lt.s32.totalorder %v19_v2, 8 }
   0x3   :  { %v22_v4 = vsel %vm21_vm0, %v18_v1, %v11_v0 }
   0x4   :  { %v29_v6 = vmul.f32 %v28_v3, %v22_v4 }
   0x6   :  { %v31_v7 = vadd.f32 %v30_v5, %v29_v6 }
   0x8   :  { %32 = vst [vmem:[%s81_s4] sm:$0xff] %v31_v7 }

</bundles_post_ra>
